<compile_context>
chip_gen: v7x
topology: tpu7x:2x2x1
jax: 0.10.0
libtpu: 0.0.40
codegen_flags: <defaults>
</compile_context>

<pallas_src>
import functools
import itertools

import jax
import jax.numpy as jnp
import numpy as np
from jax.experimental import pallas as pl
from jax.experimental.pallas import tpu as pltpu

BN_EPS = 1e-5
LANE = 128
ROW_ALIGN = 16                      # bf16 sublane tiling: second-minor % 16 == 0
STATS_ROWS = 8
VMEM_BUDGET = 40 * 1024 * 1024      # per-pass buffer budget (safe on v7x 64 MiB)
VMEM_LIMIT = 48 * 1024 * 1024       # scoped VMEM limit handed to Mosaic


def _round_up(x, m):
    return ((x + m - 1) // m) * m


def deconv_stats_kernel(xg_ref, w_ref, y_ref, stats_ref, *, n_rows, tile):
    # Fused transposed-conv matmul for one row tile:
    #   [tile, K*inc] (bf16) @ [K*inc, outc_pad] (bf16) -> f32 accumulate.
    acc = jnp.dot(xg_ref[...], w_ref[...], preferred_element_type=jnp.float32)
    y_ref[...] = acc.astype(y_ref.dtype)            # bf16 writeback (mem-bound)

    # Per-tile BatchNorm partials from the f32 accumulator: (mean_t, M2_t).
    # Padded rows of acc are exactly zero (xg padded rows are zero), but they
    # must be excluded from the deviation sum, hence the row mask.
    i = pl.program_id(0)
    n_valid = jnp.minimum(jnp.int32(tile), jnp.int32(n_rows) - i * jnp.int32(tile))
    inv_n = 1.0 / n_valid.astype(jnp.float32)
    s = jnp.sum(acc, axis=0, keepdims=True)                     # [1, outc_pad]
    mean_t = s * inv_n                                          # [1, outc_pad]
    row = jax.lax.broadcasted_iota(jnp.int32, acc.shape, 0)
    d = jnp.where(row < n_valid, acc - mean_t, 0.0)
    m2_t = jnp.sum(d * d, axis=0, keepdims=True)                # [1, outc_pad]
    srow = jax.lax.broadcasted_iota(jnp.int32, stats_ref.shape, 0)
    stats_ref[...] = jnp.where(srow == 0, mean_t,
                               jnp.where(srow == 1, m2_t, 0.0))


def bn_relu_kernel(y_ref, scale_ref, bias_ref, out_ref):
    y = y_ref[...].astype(jnp.float32)
    out_ref[...] = jnp.maximum(y * scale_ref[...] + bias_ref[...], 0.0)


@functools.partial(jax.jit, static_argnames=("row_tile", "row_tile2"))
def basic_deconvolution_block(feats, nbr, w, gamma, beta, *,
                              row_tile=2048, row_tile2=4096):
    """feats: [N, inc] f32; nbr: [K, N] int32 (index of the input point feeding
    output j through weight slice k, -1 if absent); w: [K, inc, outc];
    gamma/beta: [1, outc]. Returns [N, outc] f32 (train-mode BN semantics)."""
    N, inc = feats.shape
    K, _, outc = w.shape
    Kc = K * inc
    Kc_pad = _round_up(Kc, LANE)        # lane-dense contraction -> full MXU passes
    outc_pad = _round_up(outc, LANE)    # lane-dense y/out -> unmasked stores
    # TODO(synk): for production outc >= 128 on v6e/v7x, pad outc to 256 for
    #   full-width MXU passes (only matters once the kernel is compute-bound).

    # ---- pass-1 row tile: >=2 tiles when possible (megacore), VMEM-budgeted ----
    tile = min(row_tile, _round_up(max(-(-N // 2), ROW_ALIGN), ROW_ALIGN))

    def _p1_bytes(t):
        return (2 * t * Kc_pad * 2            # xg double buffer (bf16)
                + 2 * Kc_pad * outc_pad * 2   # weight buffers (bf16)
                + 2 * t * outc_pad * 2        # y output double buffer (bf16)
                + 2 * STATS_ROWS * outc_pad * 4)

    while tile > ROW_ALIGN and _p1_bytes(tile) > VMEM_BUDGET:
        tile = _round_up(tile // 2, ROW_ALIGN)
    Npad = _round_up(N, tile)
    num_tiles = Npad // tile

    # ---- gather + offset-fusion (XLA side): direct [N,K,inc], bf16 first ----
    feats_bf = feats.astype(jnp.bfloat16)
    nbr_t = nbr.T                                               # [N, K]
    g = feats_bf[jnp.clip(nbr_t, 0)]                            # [N, K, inc] bf16
    g = g * (nbr_t >= 0)[..., None].astype(jnp.bfloat16)        # mask missing nbrs
    xg = jnp.pad(g.reshape(N, Kc), ((0, Npad - N), (0, Kc_pad - Kc)))
    w_flat = jnp.pad(w.reshape(Kc, outc),
                     ((0, Kc_pad - Kc), (0, outc_pad - outc))).astype(jnp.bfloat16)

    # ---- pass 1: fused deconv matmul + per-tile BN partials ----
    kernel1 = functools.partial(deconv_stats_kernel, n_rows=N, tile=tile)
    y, stats = pl.pallas_call(
        kernel1,
        out_shape=(
            jax.ShapeDtypeStruct((Npad, outc_pad), jnp.bfloat16),
            jax.ShapeDtypeStruct((num_tiles * STATS_ROWS, outc_pad), jnp.float32),
        ),
        grid_spec=pltpu.PrefetchScalarGridSpec(
            num_scalar_prefetch=0,
            grid=(num_tiles,),
            in_specs=[
                pl.BlockSpec((tile, Kc_pad), lambda i: (i, 0)),
                # small weight matrix, constant block index -> DMA'd once
                pl.BlockSpec((Kc_pad, outc_pad), lambda i: (0, 0)),
            ],
            out_specs=(
                pl.BlockSpec((tile, outc_pad), lambda i: (i, 0)),
                pl.BlockSpec((STATS_ROWS, outc_pad), lambda i: (i, 0)),
            ),
        ),
        compiler_params=pltpu.CompilerParams(
            dimension_semantics=("parallel",),
            vmem_limit_bytes=VMEM_LIMIT,
        ),
    )(xg, w_flat)

    # ---- BN finalize: Chan combination of per-tile (n, mean, M2), O(outc) ----
    stats = stats.reshape(num_tiles, STATS_ROWS, outc_pad)
    mean_t = stats[:, 0, :]                                     # [T, outc_pad]
    m2_t = stats[:, 1, :]                                       # [T, outc_pad]
    n_t = jnp.clip(N - jnp.arange(num_tiles) * tile, 0, tile)
    n_t = n_t.astype(jnp.float32)[:, None]                      # [T, 1]
    n = jnp.float32(N)
    mean = jnp.sum(n_t * mean_t, axis=0) / n
    m2 = jnp.sum(m2_t, axis=0) + jnp.sum(n_t * (mean_t - mean) ** 2, axis=0)
    var = m2 / n                                  # biased (train-mode BatchNorm)
    inv = jax.lax.rsqrt(var + BN_EPS)
    gamma_p = jnp.pad(gamma.reshape(-1).astype(jnp.float32), (0, outc_pad - outc))
    beta_p = jnp.pad(beta.reshape(-1).astype(jnp.float32), (0, outc_pad - outc))
    scale = (gamma_p * inv).reshape(1, outc_pad)
    bias = (beta_p - mean * gamma_p * inv).reshape(1, outc_pad)

    # ---- pass-2 row tile: pure streaming, larger tile dividing Npad ----
    bytes_per_row2 = outc_pad * (2 * 2 + 2 * 4)   # y bf16 + out f32, double-buffered
    cap2 = max(ROW_ALIGN, VMEM_BUDGET // bytes_per_row2)
    max_mult = max(1, min(row_tile2, cap2) // tile)
    mult = 1
    for cand in range(min(num_tiles, max_mult), 0, -1):
        if num_tiles % cand == 0:
            mult = cand
            break
    tile2 = tile * mult
    num_tiles2 = Npad // tile2

    # ---- pass 2: per-tile BN apply + ReLU ----
    out = pl.pallas_call(
        bn_relu_kernel,
        out_shape=jax.ShapeDtypeStruct((Npad, outc_pad), jnp.float32),
        grid_spec=pltpu.PrefetchScalarGridSpec(
            num_scalar_prefetch=0,
            grid=(num_tiles2,),
            in_specs=[
                pl.BlockSpec((tile2, outc_pad), lambda i: (i, 0)),
                pl.BlockSpec((1, outc_pad), lambda i: (0, 0)),
                pl.BlockSpec((1, outc_pad), lambda i: (0, 0)),
            ],
            out_specs=pl.BlockSpec((tile2, outc_pad), lambda i: (i, 0)),
        ),
        compiler_params=pltpu.CompilerParams(
            dimension_semantics=("parallel",),
            vmem_limit_bytes=VMEM_LIMIT,
        ),
    )(y, scale, bias)

    # TODO(synk): callers that accept the padded [Npad, outc_pad] layout can
    #   skip this slice (it is an extra XLA copy).
    return out[:N, :outc]


def build_neighbor_table(coords_np, offsets):
    """For each point j and kernel offset k, index of the input point at
    coords[j] - offset[k], or -1 if absent (host-side glue)."""
    lut = {tuple(c): i for i, c in enumerate(coords_np.tolist())}
    N = coords_np.shape[0]
    K = len(offsets)
    idx = np.full((K, N), -1, dtype=np.int32)
    for k, (dx, dy, dz) in enumerate(offsets):
        for j in range(N):
            b, x, y, z = coords_np[j]
            q = (int(b), int(x - dx), int(y - dy), int(z - dz))
            idx[k, j] = lut.get(q, -1)
    return idx


if __name__ == "__main__":
    inc, outc, ks = 4, 8, 3
    B, G = 2, 8                      # batch size, voxel grid extent per dim
    pts_per_batch = 48
    key = jax.random.PRNGKey(0)

    # ---- synthetic sparse tensor (deterministic) ----
    k_feat, k_c0, k_c1, k_w = jax.random.split(key, 4)
    coords_list = []
    for b, kc in enumerate((k_c0, k_c1)):
        lin = jax.random.choice(kc, G * G * G, shape=(pts_per_batch,),
                                replace=False)
        lin = np.asarray(lin)
        xs, ys, zs = np.unravel_index(lin, (G, G, G))
        coords_list.append(
            np.stack([np.full_like(xs, b), xs, ys, zs], axis=1))
    coords_np = np.concatenate(coords_list, axis=0).astype(np.int32)  # [N, 4]
    N = coords_np.shape[0]
    feats = jax.random.normal(k_feat, (N, inc), dtype=jnp.float32)

    # ---- parameters (deterministic init) ----
    K = ks * ks * ks
    w = 0.1 * jax.random.normal(k_w, (K, inc, outc), dtype=jnp.float32)
    gamma = jnp.linspace(0.5, 1.5, outc, dtype=jnp.float32).reshape(1, outc)
    beta = jnp.linspace(-0.2, 0.2, outc, dtype=jnp.float32).reshape(1, outc)

    # ---- kernel map (host-side glue) ----
    offsets = list(itertools.product(range(-(ks // 2), ks // 2 + 1), repeat=3))
    nbr = jnp.asarray(build_neighbor_table(coords_np, offsets))   # [K, N]

    # ---- Pallas deconv + BN + ReLU ----
    out = basic_deconvolution_block(feats, nbr, w, gamma, beta)
    out = jax.block_until_ready(out)                              # [N, outc]

    # ---- pure-JAX f32 reference (train-mode BN semantics) ----
    gathered = jnp.where((nbr >= 0)[..., None], feats[jnp.clip(nbr, 0)], 0.0)
    y_ref = jnp.einsum("kni,kio->no", gathered, w)
    mean_r = jnp.mean(y_ref, axis=0, keepdims=True)
    var_r = jnp.mean((y_ref - mean_r) ** 2, axis=0, keepdims=True)
    ref = jnp.maximum(
        (y_ref - mean_r) * jax.lax.rsqrt(var_r + BN_EPS) * gamma + beta, 0.0)

    assert out.shape == (N, outc)
    assert bool(jnp.all(jnp.isfinite(out))) and bool(jnp.all(out >= 0.0))
    max_err = float(jnp.max(jnp.abs(out - ref)))
    assert max_err < 0.1, f"max abs err vs f32 reference: {max_err}"  # bf16 tolerance
    print("KERNEL_OK")
</pallas_src>

<mosaic_0001>
module attributes {stable_mosaic.version = 11 : i64} {
  func.func @bn_relu_kernel(%arg0: i32, %arg1: memref<96x128xbf16, #tpu.memory_space<vmem>>, %arg2: memref<1x128xf32, #tpu.memory_space<vmem>>, %arg3: memref<1x128xf32, #tpu.memory_space<vmem>>, %arg4: memref<96x128xf32, #tpu.memory_space<vmem>>) attributes {dimension_semantics = [#tpu.dimension_semantics<parallel>], iteration_bounds = array<i64: 1>, scalar_prefetch = 0 : i64, scratch_operands = 0 : i64, tpu.core_type = #tpu.core_type<tc>, window_params = [{transform_indices = @transform_0, window_bounds = array<i64: 96, 128>}, {pipeline_mode = #tpu.pipeline_mode<synchronous>, transform_indices = @transform_1, window_bounds = array<i64: 1, 128>}, {pipeline_mode = #tpu.pipeline_mode<synchronous>, transform_indices = @transform_2, window_bounds = array<i64: 1, 128>}, {transform_indices = @transform_3, window_bounds = array<i64: 96, 128>}]} {
    %c0 = arith.constant 0 : index
    %c0_0 = arith.constant 0 : index
    %0 = vector.load %arg1[%c0, %c0_0] : memref<96x128xbf16, #tpu.memory_space<vmem>>, vector<96x128xbf16>
    %1 = arith.extf %0 : vector<96x128xbf16> to vector<96x128xf32>
    %c0_1 = arith.constant 0 : index
    %c0_2 = arith.constant 0 : index
    %2 = vector.load %arg2[%c0_1, %c0_2] : memref<1x128xf32, #tpu.memory_space<vmem>>, vector<1x128xf32>
    %3 = vector.broadcast %2 : vector<1x128xf32> to vector<96x128xf32>
    %4 = arith.mulf %1, %3 : vector<96x128xf32>
    %c0_3 = arith.constant 0 : index
    %c0_4 = arith.constant 0 : index
    %5 = vector.load %arg3[%c0_3, %c0_4] : memref<1x128xf32, #tpu.memory_space<vmem>>, vector<1x128xf32>
    %6 = vector.broadcast %5 : vector<1x128xf32> to vector<96x128xf32>
    %7 = arith.addf %4, %6 : vector<96x128xf32>
    %cst = arith.constant 0.000000e+00 : f32
    %8 = vector.broadcast %cst : f32 to vector<96x128xf32>
    %9 = arith.maximumf %7, %8 : vector<96x128xf32>
    %c0_5 = arith.constant 0 : index
    %c0_6 = arith.constant 0 : index
    %10 = vector.load %arg4[%c0_5, %c0_6] : memref<96x128xf32, #tpu.memory_space<vmem>>, vector<96x128xf32>
    tpu.vector_store %arg4[%c0_5, %c0_6], %9 {strides = array<i32>} : memref<96x128xf32, #tpu.memory_space<vmem>>, vector<96x128xf32>,
    return
  }
  func.func @transform_0(%arg0: i32) -> (i32, i32) {
    %c0_i32 = arith.constant 0 : i32
    %c0_i32_0 = arith.constant 0 : i32
    return %arg0, %c0_i32 : i32, i32
  }
  func.func @transform_1(%arg0: i32) -> (i32, i32) {
    %c0_i32 = arith.constant 0 : i32
    %c0_i32_0 = arith.constant 0 : i32
    %c0_i32_1 = arith.constant 0 : i32
    return %c0_i32, %c0_i32_0 : i32, i32
  }
  func.func @transform_2(%arg0: i32) -> (i32, i32) {
    %c0_i32 = arith.constant 0 : i32
    %c0_i32_0 = arith.constant 0 : i32
    %c0_i32_1 = arith.constant 0 : i32
    return %c0_i32, %c0_i32_0 : i32, i32
  }
  func.func @transform_3(%arg0: i32) -> (i32, i32) {
    %c0_i32 = arith.constant 0 : i32
    %c0_i32_0 = arith.constant 0 : i32
    return %arg0, %c0_i32 : i32, i32
  }
}

module attributes {stable_mosaic.version = 11 : i64} {
  func.func @deconv_stats_kernel(%arg0: i32, %arg1: memref<48x128xbf16, #tpu.memory_space<vmem>>, %arg2: memref<128x128xbf16, #tpu.memory_space<vmem>>, %arg3: memref<48x128xbf16, #tpu.memory_space<vmem>>, %arg4: memref<8x128xf32, #tpu.memory_space<vmem>>) attributes {dimension_semantics = [#tpu.dimension_semantics<parallel>], iteration_bounds = array<i64: 2>, scalar_prefetch = 0 : i64, scratch_operands = 0 : i64, tpu.core_type = #tpu.core_type<tc>, window_params = [{transform_indices = @transform_0, window_bounds = array<i64: 48, 128>}, {pipeline_mode = #tpu.pipeline_mode<synchronous>, transform_indices = @transform_1, window_bounds = array<i64: 128, 128>}, {transform_indices = @transform_2, window_bounds = array<i64: 48, 128>}, {transform_indices = @transform_3, window_bounds = array<i64: 8, 128>}]} {
    %c0 = arith.constant 0 : index
    %c0_0 = arith.constant 0 : index
    %0 = vector.load %arg1[%c0, %c0_0] : memref<48x128xbf16, #tpu.memory_space<vmem>>, vector<48x128xbf16>
    %c0_1 = arith.constant 0 : index
    %c0_2 = arith.constant 0 : index
    %1 = vector.load %arg2[%c0_1, %c0_2] : memref<128x128xbf16, #tpu.memory_space<vmem>>, vector<128x128xbf16>
    %cst = arith.constant dense<0.000000e+00> : vector<48x128xf32>
    %2 = tpu.matmul %0, %1, %cst {dimension_numbers = #tpu.dot_dimension_numbers<[1], [0], [0], [1], [0, 0, 1, 1], [], []>} : vector<48x128xbf16>, vector<128x128xbf16>, vector<48x128xf32> -> vector<48x128xf32>
    %3 = arith.truncf %2 : vector<48x128xf32> to vector<48x128xbf16>
    %c0_3 = arith.constant 0 : index
    %c0_4 = arith.constant 0 : index
    %4 = vector.load %arg3[%c0_3, %c0_4] : memref<48x128xbf16, #tpu.memory_space<vmem>>, vector<48x128xbf16>
    tpu.vector_store %arg3[%c0_3, %c0_4], %3 {strides = array<i32>} : memref<48x128xbf16, #tpu.memory_space<vmem>>, vector<48x128xbf16>,
    %c48_i32 = arith.constant 48 : i32
    %5 = arith.muli %arg0, %c48_i32 : i32
    %c96_i32 = arith.constant 96 : i32
    %6 = arith.subi %c96_i32, %5 : i32
    %c48_i32_5 = arith.constant 48 : i32
    %7 = arith.minsi %c48_i32_5, %6 : i32
    %8 = arith.sitofp %7 : i32 to f32
    %cst_6 = arith.constant 1.000000e+00 : f32
    %9 = arith.divf %cst_6, %8 : f32
    %cst_7 = arith.constant dense<0.000000e+00> : vector<128xf32>
    %10 = vector.multi_reduction <add>, %2, %cst_7 [0] : vector<48x128xf32> to vector<128xf32>
    %11 = vector.shape_cast %10 : vector<128xf32> to vector<1x128xf32>
    %12 = vector.broadcast %9 : f32 to vector<1x128xf32>
    %13 = arith.mulf %11, %12 : vector<1x128xf32>
    %14 = tpu.iota {dimensions = array<i32: 0>} : vector<48x128xi32>
    %15 = vector.broadcast %7 : i32 to vector<48x128xi32>
    %16 = arith.cmpi slt, %14, %15 : vector<48x128xi32>
    %17 = vector.broadcast %13 : vector<1x128xf32> to vector<48x128xf32>
    %18 = arith.subf %2, %17 : vector<48x128xf32>
    %cst_8 = arith.constant 0.000000e+00 : f32
    %19 = vector.broadcast %cst_8 : f32 to vector<48x128xf32>
    %20 = arith.select %16, %18, %19 : vector<48x128xi1>, vector<48x128xf32>
    %21 = arith.mulf %20, %20 : vector<48x128xf32>
    %cst_9 = arith.constant dense<0.000000e+00> : vector<128xf32>
    %22 = vector.multi_reduction <add>, %21, %cst_9 [0] : vector<48x128xf32> to vector<128xf32>
    %23 = vector.shape_cast %22 : vector<128xf32> to vector<1x128xf32>
    %24 = tpu.iota {dimensions = array<i32: 0>} : vector<8x128xi32>
    %c0_i32 = arith.constant 0 : i32
    %25 = vector.broadcast %c0_i32 : i32 to vector<8x128xi32>
    %26 = arith.cmpi eq, %24, %25 : vector<8x128xi32>
    %c1_i32 = arith.constant 1 : i32
    %27 = vector.broadcast %c1_i32 : i32 to vector<8x128xi32>
    %28 = arith.cmpi eq, %24, %27 : vector<8x128xi32>
    %cst_10 = arith.constant 0.000000e+00 : f32
    %29 = vector.shape_cast %23 : vector<1x128xf32> to vector<1x128xf32>
    %30 = vector.broadcast %29 : vector<1x128xf32> to vector<8x128xf32>
    %31 = vector.broadcast %cst_10 : f32 to vector<8x128xf32>
    %32 = arith.select %28, %30, %31 : vector<8x128xi1>, vector<8x128xf32>
    %33 = vector.shape_cast %13 : vector<1x128xf32> to vector<1x128xf32>
    %34 = vector.broadcast %33 : vector<1x128xf32> to vector<8x128xf32>
    %35 = arith.select %26, %34, %32 : vector<8x128xi1>, vector<8x128xf32>
    %c0_11 = arith.constant 0 : index
    %c0_12 = arith.constant 0 : index
    %36 = vector.load %arg4[%c0_11, %c0_12] : memref<8x128xf32, #tpu.memory_space<vmem>>, vector<8x128xf32>
    tpu.vector_store %arg4[%c0_11, %c0_12], %35 {strides = array<i32>} : memref<8x128xf32, #tpu.memory_space<vmem>>, vector<8x128xf32>,
    return
  }
  func.func @transform_0(%arg0: i32) -> (i32, i32) {
    %c0_i32 = arith.constant 0 : i32
    %c0_i32_0 = arith.constant 0 : i32
    return %arg0, %c0_i32 : i32, i32
  }
  func.func @transform_1(%arg0: i32) -> (i32, i32) {
    %c0_i32 = arith.constant 0 : i32
    %c0_i32_0 = arith.constant 0 : i32
    %c0_i32_1 = arith.constant 0 : i32
    return %c0_i32, %c0_i32_0 : i32, i32
  }
  func.func @transform_2(%arg0: i32) -> (i32, i32) {
    %c0_i32 = arith.constant 0 : i32
    %c0_i32_0 = arith.constant 0 : i32
    return %arg0, %c0_i32 : i32, i32
  }
  func.func @transform_3(%arg0: i32) -> (i32, i32) {
    %c0_i32 = arith.constant 0 : i32
    %c0_i32_0 = arith.constant 0 : i32
    return %arg0, %c0_i32 : i32, i32
  }
}

</mosaic_0001>

<bundles_post_ra>
// kernel: basic_deconvolution_block.3
= control target key start
LH: loop header
LB: loop body
LE: loop exit
PB: predicated region body
PF: predicated region fallthrough
CT: control target
= control target key end

     0   :  { %s215_s0 = inlined_call_operand.vmem [shape: bf16[96,128], index: 0, kind: input, shape index: {}]   ;;  %s216_s1 = inlined_call_operand.vmem [shape: f32[1,128], index: 1, kind: input, shape index: {}]   ;;  %s217_s2 = inlined_call_operand.vmem [shape: f32[1,128], index: 2, kind: input, shape index: {}]   ;;  %s218_s3 = inlined_call_operand.vmem [shape: f32[96,128], index: 3, kind: output, shape index: {}]  }
   0x1   :  { %v107_v0 = vld [vmem:[%s215_s0] sm:$0xff]   ;;  %v130_v4 = vld [vmem:[%s215_s0 + $0x8] sm:$0xff]   ;;  %v131_v5 = vld [vmem:[%s215_s0 + $0x10] sm:$0xff]  }
   0x2   :  { %v104_v1 = vld [vmem:[%s216_s1] ss:$0 sm:$0xff]  ;;  %v108_v2 = vunpack.c.l.bf16 %v107_v0  ;;  %v109_v3 = vunpack.c.h.bf16 %v107_v0  ;;  %v132_v6 = vld [vmem:[%s215_s0 + $0x18] sm:$0xff]   ;;  %v112_v8 = vunpack.c.l.bf16 %v130_v4  ;;  %v113_v9 = vunpack.c.h.bf16 %v130_v4  ;;  %v134_v33 = vld [vmem:[%s215_s0 + $0x28] sm:$0xff]  }
   0x3   :  { %v105_v7 = vld [vmem:[%s217_s2] ss:$0 sm:$0xff]  ;;  %v116_v10 = vunpack.c.l.bf16 %v131_v5  ;;  %v117_v11 = vunpack.c.h.bf16 %v131_v5  ;;  %v120_v14 = vunpack.c.l.bf16 %v132_v6  ;;  %v121_v15 = vunpack.c.h.bf16 %v132_v6 }
   0x4   :  { %v45_v12 = vmul.f32 %v108_v2, %v104_v1  ;;  %v46_v13 = vmul.f32 %v109_v3, %v104_v1  ;;  %v47_v16 = vmul.f32 %v112_v8, %v104_v1  ;;  %v48_v17 = vmul.f32 %v113_v9, %v104_v1  ;;  %v133_v28 = vld [vmem:[%s215_s0 + $0x20] sm:$0xff]  }
   0x5   :  { %v49_v18 = vmul.f32 %v116_v10, %v104_v1  ;;  %v50_v19 = vmul.f32 %v117_v11, %v104_v1  ;;  %v51_v22 = vmul.f32 %v120_v14, %v104_v1  ;;  %v52_v23 = vmul.f32 %v121_v15, %v104_v1 }
   0x6   :  { %v64_v20 = vadd.f32 %v105_v7, %v45_v12  ;;  %v65_v21 = vadd.f32 %v105_v7, %v46_v13  ;;  %v66_v24 = vadd.f32 %v105_v7, %v47_v16  ;;  %v67_v25 = vadd.f32 %v105_v7, %v48_v17 }
   0x7   :  { %v68_v26 = vadd.f32 %v105_v7, %v49_v18  ;;  %v69_v27 = vadd.f32 %v105_v7, %v50_v19  ;;  %v70_v31 = vadd.f32 %v105_v7, %v51_v22  ;;  %v71_v32 = vadd.f32 %v105_v7, %v52_v23 }
   0x8   :  { %v76_v29 = vmax.f32 %v64_v20, 0.0  ;;  %v77_v30 = vmax.f32 %v65_v21, 0.0  ;;  %v78_v34 = vmax.f32 %v66_v24, 0.0  ;;  %v79_v35 = vmax.f32 %v67_v25, 0.0 }
   0x9   :  { %v80_v36 = vmax.f32 %v68_v26, 0.0  ;;  %v81_v37 = vmax.f32 %v69_v27, 0.0  ;;  %v82_v38 = vmax.f32 %v70_v31, 0.0  ;;  %v83_v39 = vmax.f32 %v71_v32, 0.0 }
   0xa   :  { %88 = vst [vmem:[%s218_s3] sm:$0xff] %v76_v29  ;;  %89 = vst [vmem:[%s218_s3 + $0x8] sm:$0xff] %v77_v30  ;;  %v124_v40 = vunpack.c.l.bf16 %v133_v28  ;;  %v125_v41 = vunpack.c.h.bf16 %v133_v28  ;;  %v128_v42 = vunpack.c.l.bf16 %v134_v33  ;;  %v129_v43 = vunpack.c.h.bf16 %v134_v33 }
   0xb   :  { %90 = vst [vmem:[%s218_s3 + $0x10] sm:$0xff] %v78_v34  ;;  %91 = vst [vmem:[%s218_s3 + $0x18] sm:$0xff] %v79_v35 }
   0xc   :  { %92 = vst [vmem:[%s218_s3 + $0x20] sm:$0xff] %v80_v36  ;;  %93 = vst [vmem:[%s218_s3 + $0x28] sm:$0xff] %v81_v37  ;;  %v53_v44 = vmul.f32 %v124_v40, %v104_v1  ;;  %v54_v45 = vmul.f32 %v125_v41, %v104_v1  ;;  %v55_v46 = vmul.f32 %v128_v42, %v104_v1 }
   0xd   :  { %94 = vst [vmem:[%s218_s3 + $0x30] sm:$0xff] %v82_v38  ;;  %95 = vst [vmem:[%s218_s3 + $0x38] sm:$0xff] %v83_v39  ;;  %v56_v47 = vmul.f32 %v129_v43, %v104_v1 }
   0xe   :  { %v72_v48 = vadd.f32 %v105_v7, %v53_v44  ;;  %v73_v49 = vadd.f32 %v105_v7, %v54_v45  ;;  %v74_v50 = vadd.f32 %v105_v7, %v55_v46 }
   0xf   :  { %v75_v51 = vadd.f32 %v105_v7, %v56_v47 }
  0x10   :  { %v84_v52 = vmax.f32 %v72_v48, 0.0  ;;  %v85_v53 = vmax.f32 %v73_v49, 0.0  ;;  %v86_v54 = vmax.f32 %v74_v50, 0.0 }
  0x11   :  { %v87_v55 = vmax.f32 %v75_v51, 0.0 }
  0x12   :  { %96 = vst [vmem:[%s218_s3 + $0x40] sm:$0xff] %v84_v52  ;;  %97 = vst [vmem:[%s218_s3 + $0x48] sm:$0xff] %v85_v53 }
  0x13   :  { %98 = vst [vmem:[%s218_s3 + $0x50] sm:$0xff] %v86_v54  ;;  %99 = vst [vmem:[%s218_s3 + $0x58] sm:$0xff] %v87_v55 }

// kernel: basic_deconvolution_block.2
= control target key start
LH: loop header
LB: loop body
LE: loop exit
PB: predicated region body
PF: predicated region fallthrough
CT: control target
= control target key end

     0   :  { %s677_s12 = smov 0   ;;  %s746_s0 = inlined_call_operand.vmem [shape: bf16[96,128], index: 0, kind: input, shape index: {}]   ;;  %s747_s1 = inlined_call_operand.vmem [shape: bf16[128,128], index: 1, kind: input, shape index: {}]   ;;  %s748_s2 = inlined_call_operand.vmem [shape: bf16[96,128], index: 2, kind: output, shape index: {0}]   ;;  %s749_s3 = inlined_call_operand.vmem [shape: f32[16,128], index: 3, kind: output, shape index: {1}]  }
   0x1 LB: > { %s683_s13 = sadd.s32 4294967295, %s653_s12   ;;  %p521_p0 = scmp.ge.s32.totalorder %s653_s12, 1  ;;  %s653_s12 = sphi %s677_s12, %s14_s12  }
   0x2   : > { %p141_p1 = scmp.lt.s32.totalorder %s653_s12, 3 }
   0x4   : > { %p142_p2 = pnand %p521_p0, %p141_p1 }
   0x5   : > { %v634_v0 = vld [vmem:[%s747_s1] sm:$0xff] (!%p142_p2)   ;;  %v655_v1 = vmov (!%p142_p2), 0.0   ;;  %v635_v2 = vld [vmem:[%s747_s1 + $0x8] sm:$0xff] (!%p142_p2)   ;;  %s169_s18 = smul.u32 (!%p142_p2), 6, %s683_s13  ;;  %vm656_vm0 = vmmov (!%p142_p2), 0   ;;  %v636_v3 = vld [vmem:[%s747_s1 + $0x10] sm:$0xff] (!%p142_p2)   ;;  %v382_v34 = vlaneseq (!%p142_p2) }
   0x6   : > { %145 = sbr.rel (%p142_p2) target bundleno = 306 (0x132), region = 28  ;;  %578 = vmatprep.subr.bf16.mxu0 (!%p142_p2), %v655_v1  ;;  %606 = vmatprep.subr.bf16.mxu1 (!%p142_p2), %v655_v1  ;;  %v637_v4 = vld [vmem:[%s747_s1 + $0x18] sm:$0xff] (!%p142_p2)   ;;  %v638_v5 = vld [vmem:[%s747_s1 + $0x20] sm:$0xff] (!%p142_p2)   ;;  %v639_v7 = vld [vmem:[%s747_s1 + $0x28] sm:$0xff] (!%p142_p2)   ;;  %p181_p5 = scmp.lt.s32.totalorder (!%p142_p2), %s683_s13, 1 }
   0x7   : > { %579 = vmatpush3.bf16.msra.mxu0 (!%p142_p2), %v634_v0  ;;  %614 = vmatpush3.bf16.msra.mxu1 (!%p142_p2), %v634_v0  ;;  %s361_s19 = smul.u32 (!%p142_p2), 48, %s683_s13  ;;  %p170_p3 = scmp.lt.s32.totalorder (!%p142_p2), %s169_s18, 11  ;;  %v640_v8 = vld [vmem:[%s747_s1 + $0x30] sm:$0xff] (!%p142_p2)   ;;  %v641_v10 = vld [vmem:[%s747_s1 + $0x38] sm:$0xff] (!%p142_p2)   ;;  %v383_v37 = vshrl.u32 (!%p142_p2), %v382_v34, 7 }
   0x8   : > { %580 = vmatprep.subr.bf16.mxu0 (!%p142_p2), %v655_v1  ;;  %607 = vmatprep.subr.bf16.mxu1 (!%p142_p2), %v655_v1 }
   0x9   : > { %594 = vmatprep.mubr.msk.bf16.mxu0 (!%p142_p2), %vm656_vm0, %v655_v1  ;;  %598 = vmatprep.mubr.msk.bf16.mxu1 (!%p142_p2), %vm656_vm0, %v655_v1  ;;  %s362_s20 = ssub.s32 (!%p142_p2), 96, %s361_s19  ;;  %v384_v40 = vadd.s32 (!%p142_p2), 8, %v383_v37  ;;  %v385_v41 = vadd.s32 (!%p142_p2), 16, %v383_v37  ;;  %v386_v44 = vadd.s32 (!%p142_p2), 24, %v383_v37  ;;  %v387_v45 = vadd.s32 (!%p142_p2), 32, %v383_v37 }
   0xa   : > { %p363_p4 = scmp.lt.s32.totalorder (!%p142_p2), %s362_s20, 48  ;;  %v388_v46 = vadd.s32 (!%p142_p2), 40, %v383_v37  ;;  %vm426_vm7 = vcmp.eq.s32.totalorder (!%p142_p2), %v383_v37, 1  ;;  %vm425_vm8 = vcmp.eq.s32.totalorder (!%p142_p2), %v383_v37, 0 }
   0xb   : > { %581 = vmatpush3.bf16.msra.mxu0 (!%p142_p2), %v635_v2  ;;  %615 = vmatpush3.bf16.msra.mxu1 (!%p142_p2), %v635_v2 }
   0xc   : > { %582 = vmatprep.subr.bf16.mxu0 (!%p142_p2), %v655_v1  ;;  %608 = vmatprep.subr.bf16.mxu1 (!%p142_p2), %v655_v1 }
   0xd   : > { %s751_s18 = smov (!%p170_p3, %s169_s18), 11  ;;  %s753_s20 = smov (!%p363_p4, %s362_s20), 48 }
   0xe   : > { %s522_s23 = sshll.u32 %s751_s18, 2  ;;  %s365_s29 = scvt.s32.f32 %s753_s20  ;;  %v389_v42 = vstv %s753_s20 }
   0xf   : > { %s708_s26 = scalar_lea.vmem %s746_s0, %s522_s23  ;;  %583 = vmatpush3.bf16.msra.mxu0 %v636_v3  ;;  %616 = vmatpush3.bf16.msra.mxu1 %v636_v3  ;;  %s179_s15 = scalar_lea.vmem %s748_s2, %s522_s23  ;;  %vm390_vm1 = vcmp.lt.s32.totalorder %v383_v37, %v389_v42  ;;  %vm391_vm2 = vcmp.lt.s32.totalorder %v384_v40, %v389_v42  ;;  %vm392_vm3 = vcmp.lt.s32.totalorder %v385_v41, %v389_v42 }
  0x10   : > { %584 = vmatprep.subr.bf16.mxu0 %v655_v1  ;;  %609 = vmatprep.subr.bf16.mxu1 %v655_v1  ;;  %v366_v6 = vstv %s365_s29  ;;  %v642_v11 = vld [vmem:[%s708_s26] sm:$0xff]   ;;  %v643_v12 = vld [vmem:[%s708_s26 + $0x8] sm:$0xff]   ;;  %v644_v13 = vld [vmem:[%s708_s26 + $0x10] sm:$0xff]   ;;  %vm393_vm4 = vcmp.lt.s32.totalorder %v386_v44, %v389_v42  ;;  %vm394_vm5 = vcmp.lt.s32.totalorder %v387_v45, %v389_v42  ;;  %vm395_vm6 = vcmp.lt.s32.totalorder %v388_v46, %v389_v42  ;;  %s755_s13 = smov (!%p181_p5, %s683_s13), 1 }
  0x11   : > { %645 = vrcp.f32 %v366_v6  ;;  %s524_s17 = sshll.u32 %s755_s13, 3 }
  0x12   : > { %s184_s20 = scalar_lea.vmem %s749_s3, %s524_s17 }
  0x13   : > { %585 = vmatpush3.bf16.msra.mxu0 %v637_v4  ;;  %617 = vmatpush3.bf16.msra.mxu1 %v637_v4 }
  0x14   : > { %586 = vmatprep.subr.bf16.mxu0 %v655_v1  ;;  %610 = vmatprep.subr.bf16.mxu1 %v655_v1 }
  0x17   : > { %587 = vmatpush3.bf16.msra.mxu0 %v638_v5  ;;  %618 = vmatpush3.bf16.msra.mxu1 %v638_v5 }
  0x18   : > { %588 = vmatprep.subr.bf16.mxu0 %v655_v1  ;;  %611 = vmatprep.subr.bf16.mxu1 %v655_v1 }
  0x1b   : > { %589 = vmatpush3.bf16.msra.mxu0 %v639_v7  ;;  %619 = vmatpush3.bf16.msra.mxu1 %v639_v7  ;;  %v646_v9 = vpop.eup %645 }
  0x1c   : > { %590 = vmatprep.subr.bf16.mxu0 %v655_v1  ;;  %612 = vmatprep.subr.bf16.mxu1 %v655_v1  ;;  %622 = vpush %v646_v9 }
  0x1f   : > { %591 = vmatpush3.bf16.msra.mxu0 %v640_v8  ;;  %620 = vmatpush3.bf16.msra.mxu1 %v640_v8 }
  0x20   : > { %592 = vmatprep.subr.bf16.mxu0 %v655_v1  ;;  %613 = vmatprep.subr.bf16.mxu1 %v655_v1 }
  0x23   : > { %593 = vmatpush3.bf16.msra.mxu0 %v641_v10  ;;  %621 = vmatpush3.bf16.msra.mxu1 %v641_v10 }
  0x26   : > { %595 = vmatmul.mubr.bf16.vlgmr.msra.gmra.mrb[0].mxu0 %v642_v11  ;;  %599 = vmatmul.mubr.bf16.vlgmr.msra.gmra.mrb[0].mxu1 %v643_v12 }
  0x27   : > { %602 = vmatprep.mubr.msk.bf16.mxu1 %vm656_vm0, %v655_v1 }
  0x2e   : > { %603 = vmatmul.mubr.bf16.gmra.mrb[4].mxu1 %v644_v13 }
  0x4d   : > { %s623_s16 = spop %622 }
  0x4e   : > { %v380_v47 = vstv %s623_s16 }
  0xf9   : > { %v308_v14 = vpop.f32.mrb[0].mxu0  ;;  %v316_v15 = vpop.f32.mrb[0].mxu1 }
  0xfa   : > { %v596_v16 = vpop.f32.mrb[1].mxu0  ;;  %v600_v17 = vpop.f32.mrb[1].mxu1 }
  0xfb   : > { %v311_v18 = vpop.f32.mrb[2].mxu0  ;;  %v319_v19 = vpop.f32.mrb[2].mxu1 }
  0xfc   : > { %v553_v20 = vpack.c.bf16 %v311_v18, %v308_v14  ;;  %v369_v21 = vadd.f32 %v311_v18, %v308_v14  ;;  %v558_v22 = vpack.c.bf16 %v319_v19, %v316_v15  ;;  %v597_v23 = vpop.f32.mrb[3].mxu0  ;;  %v601_v24 = vpop.f32.mrb[3].mxu1 }
  0xfe   : > { %554 = vst [vmem:[%s179_s15] sm:$0xff] %v553_v20   ;;  %565 = vst [vmem:[%s179_s15 + $0x8] sm:$0xff] %v558_v22   ;;  %v370_v25 = vadd.f32 %v369_v21, %v316_v15 }
 0x100   : > { %v371_v26 = vadd.f32 %v370_v25, %v319_v19 }
 0x101   : > { %v324_v27 = vpop.f32.mrb[4].mxu1 }
 0x102   : > { %v372_v28 = vadd.f32 %v371_v26, %v324_v27  ;;  %v604_v29 = vpop.f32.mrb[5].mxu1 }
 0x103   : > { %v327_v30 = vpop.f32.mrb[6].mxu1 }
 0x104   : > { %v563_v31 = vpack.c.bf16 %v327_v30, %v324_v27  ;;  %v373_v32 = vadd.f32 %v372_v28, %v327_v30  ;;  %v605_v33 = vpop.f32.mrb[7].mxu1 }
 0x106   : > { %566 = vst [vmem:[%s179_s15 + $0x10] sm:$0xff] %v563_v31   ;;  %v374_v35 = vrot.slane %v373_v32, 4 }
 0x108   : > { %v375_v36 = vadd.f32 %v374_v35, %v373_v32 }
 0x10a   : > { %v376_v38 = vrot.slane %v375_v36, 2 }
 0x10c   : > { %v377_v39 = vadd.f32 %v376_v38, %v375_v36 }
 0x10e   : > { %v378_v43 = vrot.slane %v377_v39, 1 }
 0x110   : > { %v379_v48 = vadd.f32 %v378_v43, %v377_v39 }
 0x112   : > { %v381_v49 = vmul.f32 %v380_v47, %v379_v48 }
 0x114   : > { %v396_v50 = vsub.f32 %v308_v14, %v381_v49  ;;  %v397_v51 = vsub.f32 %v311_v18, %v381_v49  ;;  %v398_v52 = vsub.f32 %v316_v15, %v381_v49  ;;  %v399_v53 = vsub.f32 %v319_v19, %v381_v49 }
 0x115   : > { %v400_v54 = vsub.f32 %v324_v27, %v381_v49  ;;  %v401_v55 = vsub.f32 %v327_v30, %v381_v49 }
 0x116   : > { %v402_v56 = vsel %vm390_vm1, %v396_v50, 0.0  ;;  %v403_v57 = vsel %vm391_vm2, %v397_v51, 0.0  ;;  %v404_v58 = vsel %vm392_vm3, %v398_v52, 0.0  ;;  %v405_v59 = vsel %vm393_vm4, %v399_v53, 0.0 }
 0x117   : > { %v406_v60 = vsel %vm394_vm5, %v400_v54, 0.0  ;;  %v407_v61 = vsel %vm395_vm6, %v401_v55, 0.0  ;;  %v408_v62 = vmul.f32 %v402_v56, %v402_v56  ;;  %v409_v63 = vmul.f32 %v403_v57, %v403_v57 }
 0x118   : > { %v410_v0 = vmul.f32 %v404_v58, %v404_v58  ;;  %v411_v2 = vmul.f32 %v405_v59, %v405_v59  ;;  %v412_v4 = vmul.f32 %v406_v60, %v406_v60  ;;  %v413_v6 = vmul.f32 %v407_v61, %v407_v61 }
 0x119   : > { %v414_v1 = vadd.f32 %v409_v63, %v408_v62 }
 0x11b   : > { %v415_v3 = vadd.f32 %v414_v1, %v410_v0 }
 0x11d   : > { %v416_v5 = vadd.f32 %v415_v3, %v411_v2 }
 0x11f   : > { %v417_v7 = vadd.f32 %v416_v5, %v412_v4 }
 0x121   : > { %v418_v8 = vadd.f32 %v417_v7, %v413_v6 }
 0x123   : > { %v419_v9 = vrot.slane %v418_v8, 4 }
 0x125   : > { %v420_v10 = vadd.f32 %v419_v9, %v418_v8 }
 0x127   : > { %v421_v11 = vrot.slane %v420_v10, 2 }
 0x129   : > { %v422_v12 = vadd.f32 %v421_v11, %v420_v10 }
 0x12b   : > { %v423_v13 = vrot.slane %v422_v12, 1 }
 0x12d   : > { %v424_v14 = vadd.f32 %v423_v13, %v422_v12 }
 0x12f   : > { %v427_v15 = vsel %vm426_vm7, %v424_v14, 0.0 }
 0x130   : > { %v428_v16 = vsel %vm425_vm8, %v381_v49, %v427_v15 }
 0x131   : > { %429 = vst [vmem:[%s184_s20] sm:$0xff] %v428_v16 }
 0x132 PF: > { %s14_s12 = sadd.s32 1, %s653_s12  }
 0x133   : > { %p11_p6 = scmp.ge.s32.totalorder %s14_s12, 4  }
 0x135   :  { %13 = sbr.rel (!%p11_p6) target bundleno = 1 (0x1), region = 70 }

</bundles_post_ra>
